<compile_context>
chip_gen: v5e
topology: v5e:2x2
jax: 0.10.0
libtpu: 0.0.40
codegen_flags: <defaults>
</compile_context>

<pallas_src>
import functools

import jax
import jax.numpy as jnp
from jax.experimental import pallas as pl
from jax.experimental.pallas import tpu as pltpu


_H1 = 128      # layer-1 width
_H2 = 64       # layer-2 logical width (zero-padded to 128 lanes in the buffer)
_LANES = 128
_ALIGN = 16    # bf16 sublane-tile height: every packed block starts 16-row aligned


def _round_up(x, m):
    return (x + m - 1) // m * m


def _layout():
    """Static 16-row-aligned offsets of each parameter block in the packed buffer."""
    r_w1 = 0                       # (128, 128): rows d_in:128 are zero
    r_b1 = r_w1 + _LANES           # bias rows get a full 16-row (bf16 tile) block
    r_w2 = r_b1 + _ALIGN           # (128, 128): cols 64:128 are zero
    r_b2 = r_w2 + _LANES
    r_w3 = r_b2 + _ALIGN           # (128, 128): rows 64:128 and cols d_out:128 zero
    r_b3 = r_w3 + _LANES
    r_total = r_b3 + _ALIGN        # = 432 rows
    return dict(r_w1=r_w1, r_b1=r_b1, r_w2=r_w2, r_b2=r_b2,
                r_w3=r_w3, r_b3=r_b3, r_total=r_total)


def pack_actor_params(params):
    """Pack w1,b1,w2,b2,w3,b3 into a single zero-padded bf16 [432, 128] buffer.

    Weights are stored [in_features, out_features] (pre-transposed vs PyTorch) so
    the kernel does plain x @ W + b.  All padding is exact zeros, so the math is
    identical to the reference (modulo bf16 rounding of the stored parameters,
    which matches the MXU's default bf16-multiply / f32-accumulate path anyway).
    """
    w1, b1 = params["w1"], params["b1"]            # (d_in, 128), (1, 128)
    w2, b2 = params["w2"], params["b2"]            # (128, 64),   (1, 64)
    w3, b3 = params["w3"], params["b3"]            # (64, d_out), (1, d_out)
    d_in = w1.shape[0]
    d_out = w3.shape[1]
    assert d_in <= _LANES and d_out <= _LANES
    lo = _layout()

    p = jnp.zeros((lo["r_total"], _LANES), jnp.float32)
    p = p.at[lo["r_w1"]:lo["r_w1"] + d_in, :].set(w1.astype(jnp.float32))
    p = p.at[lo["r_b1"], :].set(b1.reshape(-1).astype(jnp.float32))
    p = p.at[lo["r_w2"]:lo["r_w2"] + _H1, 0:_H2].set(w2.astype(jnp.float32))
    p = p.at[lo["r_b2"], 0:_H2].set(b2.reshape(-1).astype(jnp.float32))
    p = p.at[lo["r_w3"]:lo["r_w3"] + _H2, 0:d_out].set(w3.astype(jnp.float32))
    p = p.at[lo["r_b3"], 0:d_out].set(b3.reshape(-1).astype(jnp.float32))
    return p.astype(jnp.bfloat16)


def _actor_kernel(x_ref, p_ref, o_ref, *, lo):
    # x_ref: (TB, 128) bf16 lane-padded [obs|ah|fu|0...]
    # p_ref: (432, 128) bf16 packed weights/biases (VMEM-resident, constant block)
    # o_ref: (TB, 128) f32 lane-dense output (cols d_out:128 are exact zeros)

    # ---- layer 1: single aligned 128-wide matmul (padded rows/lanes give 0) ----
    w1 = p_ref[lo["r_w1"]:lo["r_w1"] + _LANES, :]             # (128, 128), aligned
    b1 = p_ref[lo["r_b1"]:lo["r_b1"] + 1, :].astype(jnp.float32)
    h = jnp.dot(x_ref[...], w1, preferred_element_type=jnp.float32)
    h = jnp.tanh(h + b1)                                      # (TB, 128) f32

    # ---- layer 2 (cols 64:128 of w2/b2 are zero -> padded lanes stay 0) ----
    w2 = p_ref[lo["r_w2"]:lo["r_w2"] + _LANES, :]             # (128, 128), aligned
    b2 = p_ref[lo["r_b2"]:lo["r_b2"] + 1, :].astype(jnp.float32)
    h = jnp.tanh(jnp.dot(h.astype(jnp.bfloat16), w2,
                         preferred_element_type=jnp.float32) + b2)

    # ---- layer 3 (rows 64:128 of w3 zero match h's zero lanes) ----
    w3 = p_ref[lo["r_w3"]:lo["r_w3"] + _LANES, :]             # (128, 128), aligned
    b3 = p_ref[lo["r_b3"]:lo["r_b3"] + 1, :].astype(jnp.float32)
    h = jnp.tanh(jnp.dot(h.astype(jnp.bfloat16), w3,
                         preferred_element_type=jnp.float32) + b3)

    # Lane-dense store: full 128-wide tile; wrapper slices the first d_out cols.
    o_ref[...] = h.astype(o_ref.dtype)


def actor_forward(obs, ah, fu, packed_params, d_out, *, tile_b=512):
    """Actor forward: one pallas_call, weights VMEM-resident, batch on the grid."""
    lo = _layout()
    assert packed_params.shape == (lo["r_total"], _LANES)
    assert packed_params.dtype == jnp.bfloat16

    # Fused-in concat + lane padding done once in the wrapper (cheap XLA ops),
    # so the kernel sees a single lane-dense, aligned (B, 128) input.
    x = jnp.concatenate([obs, ah, fu], axis=1).astype(jnp.float32)
    b, d_in = x.shape
    assert d_in <= _LANES and d_out <= _LANES
    if d_in < _LANES:
        x = jnp.pad(x, ((0, 0), (0, _LANES - d_in)))
    x = x.astype(jnp.bfloat16)

    # Batch tiling: pick the tile that minimizes padding waste (instead of
    # padding e.g. b=300 up to 512).  tile_b is large enough to amortize the
    # ~0.35us per-grid-step overhead and to feed the 256-wide MXU on v6e/v7x.
    n_tiles = pl.cdiv(b, tile_b)
    tile = _round_up(pl.cdiv(b, n_tiles), 8)
    b_padded = tile * n_tiles
    if b_padded != b:
        x = jnp.pad(x, ((0, b_padded - b), (0, 0)))

    kernel = functools.partial(_actor_kernel, lo=lo)

    cost = pl.CostEstimate(
        flops=2 * b_padded * 3 * _LANES * _LANES,
        transcendentals=b_padded * 3 * _LANES,      # tanh over the padded lanes
        bytes_accessed=(2 * packed_params.size            # bf16 weights
                        + 2 * b_padded * _LANES            # bf16 input
                        + 4 * b_padded * _LANES),           # f32 output
    )

    out = pl.pallas_call(
        kernel,
        out_shape=jax.ShapeDtypeStruct((b_padded, _LANES), jnp.float32),
        grid=(n_tiles,),
        in_specs=[
            pl.BlockSpec((tile, _LANES), lambda i: (i, 0)),
            # Constant block index -> weights DMA'd once, VMEM-resident while
            # activation tiles stream/double-buffer.
            pl.BlockSpec((lo["r_total"], _LANES), lambda i: (0, 0)),
        ],
        out_specs=pl.BlockSpec((tile, _LANES), lambda i: (i, 0)),
        compiler_params=pltpu.CompilerParams(
            dimension_semantics=("parallel",)),
        cost_estimate=cost,
    )(x, packed_params)

    return out[:b, :d_out]


def init_actor_params(key, input_dim, output_dim):
    """Deterministic synthetic parameters (PyTorch-like uniform fan-in init)."""
    ks = jax.random.split(key, 6)

    def linear(kw, kb, d_in, d_out):
        bound = 1.0 / jnp.sqrt(jnp.float32(d_in))
        w = jax.random.uniform(kw, (d_in, d_out), jnp.float32, -bound, bound)
        b = jax.random.uniform(kb, (1, d_out), jnp.float32, -bound, bound)
        return w, b

    w1, b1 = linear(ks[0], ks[1], input_dim, _H1)
    w2, b2 = linear(ks[2], ks[3], _H1, _H2)
    w3, b3 = linear(ks[4], ks[5], _H2, output_dim)
    return {"w1": w1, "b1": b1, "w2": w2, "b2": b2, "w3": w3, "b3": b3}


def actor_ref(obs, ah, fu, params):
    """Pure-JAX f32 reference for correctness checking (mirrors the PyTorch module)."""
    x = jnp.concatenate([obs, ah, fu], axis=1).astype(jnp.float32)
    h = jnp.tanh(x @ params["w1"] + params["b1"])
    h = jnp.tanh(h @ params["w2"] + params["b2"])
    return jnp.tanh(h @ params["w3"] + params["b3"])


if __name__ == "__main__":
    key = jax.random.PRNGKey(0)
    k_obs, k_ah, k_fu, k_params = jax.random.split(key, 4)

    batch = 8
    obs_dim, ah_dim, fu_dim = 12, 8, 4        # input_dim = 24
    output_dim = 4

    obs = jax.random.normal(k_obs, (batch, obs_dim), jnp.float32)
    ah = jax.random.normal(k_ah, (batch, ah_dim), jnp.float32)
    fu = jax.random.normal(k_fu, (batch, fu_dim), jnp.float32)

    params = init_actor_params(k_params, obs_dim + ah_dim + fu_dim, output_dim)
    packed = pack_actor_params(params)

    out = actor_forward(obs, ah, fu, packed, output_dim)
    jax.block_until_ready(out)

    ref = actor_ref(obs, ah, fu, params)
    assert out.shape == (batch, output_dim)
    err = float(jnp.max(jnp.abs(out - ref)))
    # bf16-stored weights / bf16 MXU operands vs the f32 reference: a few 1e-3.
    assert err < 2e-2, f"max abs error {err}"

    print("KERNEL_OK")
</pallas_src>

<mosaic_0001>
module attributes {stable_mosaic.version = 11 : i64} {
  func.func @_actor_kernel(%arg0: i32, %arg1: memref<8x128xbf16, #tpu.memory_space<vmem>>, %arg2: memref<432x128xbf16, #tpu.memory_space<vmem>>, %arg3: memref<8x128xf32, #tpu.memory_space<vmem>>) attributes {dimension_semantics = [#tpu.dimension_semantics<parallel>], iteration_bounds = array<i64: 1>, scalar_prefetch = 0 : i64, scratch_operands = 0 : i64, tpu.core_type = #tpu.core_type<tc>, window_params = [{transform_indices = @transform_0, window_bounds = array<i64: 8, 128>}, {pipeline_mode = #tpu.pipeline_mode<synchronous>, transform_indices = @transform_1, window_bounds = array<i64: 432, 128>}, {transform_indices = @transform_2, window_bounds = array<i64: 8, 128>}]} {
    %c0 = arith.constant 0 : index
    %c0_0 = arith.constant 0 : index
    %0 = vector.load %arg2[%c0, %c0_0] : memref<432x128xbf16, #tpu.memory_space<vmem>>, vector<128x128xbf16>
    %c128 = arith.constant 128 : index
    %c0_1 = arith.constant 0 : index
    %1 = vector.load %arg2[%c128, %c0_1] : memref<432x128xbf16, #tpu.memory_space<vmem>>, vector<1x128xbf16>
    %2 = arith.extf %1 : vector<1x128xbf16> to vector<1x128xf32>
    %c0_2 = arith.constant 0 : index
    %c0_3 = arith.constant 0 : index
    %3 = vector.load %arg1[%c0_2, %c0_3] : memref<8x128xbf16, #tpu.memory_space<vmem>>, vector<8x128xbf16>
    %cst = arith.constant dense<0.000000e+00> : vector<8x128xf32>
    %4 = tpu.matmul %3, %0, %cst {dimension_numbers = #tpu.dot_dimension_numbers<[1], [0], [0], [1], [0, 0, 1, 1], [], []>} : vector<8x128xbf16>, vector<128x128xbf16>, vector<8x128xf32> -> vector<8x128xf32>
    %5 = vector.broadcast %2 : vector<1x128xf32> to vector<8x128xf32>
    %6 = arith.addf %4, %5 : vector<8x128xf32>
    %7 = math.tanh %6 : vector<8x128xf32>
    %c144 = arith.constant 144 : index
    %c0_4 = arith.constant 0 : index
    %8 = vector.load %arg2[%c144, %c0_4] : memref<432x128xbf16, #tpu.memory_space<vmem>>, vector<128x128xbf16>
    %c272 = arith.constant 272 : index
    %c0_5 = arith.constant 0 : index
    %9 = vector.load %arg2[%c272, %c0_5] : memref<432x128xbf16, #tpu.memory_space<vmem>>, vector<1x128xbf16>
    %10 = arith.extf %9 : vector<1x128xbf16> to vector<1x128xf32>
    %11 = arith.truncf %7 : vector<8x128xf32> to vector<8x128xbf16>
    %cst_6 = arith.constant dense<0.000000e+00> : vector<8x128xf32>
    %12 = tpu.matmul %11, %8, %cst_6 {dimension_numbers = #tpu.dot_dimension_numbers<[1], [0], [0], [1], [0, 0, 1, 1], [], []>} : vector<8x128xbf16>, vector<128x128xbf16>, vector<8x128xf32> -> vector<8x128xf32>
    %13 = vector.broadcast %10 : vector<1x128xf32> to vector<8x128xf32>
    %14 = arith.addf %12, %13 : vector<8x128xf32>
    %15 = math.tanh %14 : vector<8x128xf32>
    %c288 = arith.constant 288 : index
    %c0_7 = arith.constant 0 : index
    %16 = vector.load %arg2[%c288, %c0_7] : memref<432x128xbf16, #tpu.memory_space<vmem>>, vector<128x128xbf16>
    %c416 = arith.constant 416 : index
    %c0_8 = arith.constant 0 : index
    %17 = vector.load %arg2[%c416, %c0_8] : memref<432x128xbf16, #tpu.memory_space<vmem>>, vector<1x128xbf16>
    %18 = arith.extf %17 : vector<1x128xbf16> to vector<1x128xf32>
    %19 = arith.truncf %15 : vector<8x128xf32> to vector<8x128xbf16>
    %cst_9 = arith.constant dense<0.000000e+00> : vector<8x128xf32>
    %20 = tpu.matmul %19, %16, %cst_9 {dimension_numbers = #tpu.dot_dimension_numbers<[1], [0], [0], [1], [0, 0, 1, 1], [], []>} : vector<8x128xbf16>, vector<128x128xbf16>, vector<8x128xf32> -> vector<8x128xf32>
    %21 = vector.broadcast %18 : vector<1x128xf32> to vector<8x128xf32>
    %22 = arith.addf %20, %21 : vector<8x128xf32>
    %23 = math.tanh %22 : vector<8x128xf32>
    %c0_10 = arith.constant 0 : index
    %c0_11 = arith.constant 0 : index
    %24 = vector.load %arg3[%c0_10, %c0_11] : memref<8x128xf32, #tpu.memory_space<vmem>>, vector<8x128xf32>
    tpu.vector_store %arg3[%c0_10, %c0_11], %23 {strides = array<i32>} : memref<8x128xf32, #tpu.memory_space<vmem>>, vector<8x128xf32>,
    return
  }
  func.func @transform_0(%arg0: i32) -> (i32, i32) {
    %c0_i32 = arith.constant 0 : i32
    %c0_i32_0 = arith.constant 0 : i32
    return %arg0, %c0_i32 : i32, i32
  }
  func.func @transform_1(%arg0: i32) -> (i32, i32) {
    %c0_i32 = arith.constant 0 : i32
    %c0_i32_0 = arith.constant 0 : i32
    %c0_i32_1 = arith.constant 0 : i32
    return %c0_i32, %c0_i32_0 : i32, i32
  }
  func.func @transform_2(%arg0: i32) -> (i32, i32) {
    %c0_i32 = arith.constant 0 : i32
    %c0_i32_0 = arith.constant 0 : i32
    return %arg0, %c0_i32 : i32, i32
  }
}

</mosaic_0001>

<bundles_post_ra>
// kernel: tpu_custom_call.1
= control target key start
LH: loop header
LB: loop body
LE: loop exit
PB: predicated region body
PF: predicated region fallthrough
CT: control target
= control target key end

     0   :  { %7 = vsyncpa [#allocation3], 0  ;;  %s545_s0 = inlined_call_operand.hbm [shape: bf16[8,128], index: 0, kind: input, shape index: {}]   ;;  %s546_s1 = inlined_call_operand.hbm [shape: bf16[432,128], index: 1, kind: input, shape index: {}]   ;;  %s547_s2 = inlined_call_operand.hbm [shape: f32[8,128], index: 2, kind: output, shape index: {}]  }
   0x1   :  { %8 = vsyncpa [#allocation6], 0 }
   0x2   :  { %9 = vsyncpa [#allocation4], 0  ;;  %s15_s11 = sshll.u32 %s545_s0, 4  ;;  %s516_s12 = smov [#allocation2]   ;;  %s16_s11 = int_to_ptr.hbm [resolvable:$true] %s15_s11 }
   0x3   :  { %s17_s13 = sshll.u32 %s516_s12, 4  ;;  %s25_s16 = sshll.u32 %s546_s1, 4  ;;  %s18_s13 = int_to_ptr.vmem [resolvable:$true] %s17_s13  ;;  %s26_s16 = int_to_ptr.hbm [resolvable:$true] %s25_s16 }
   0x4   :  { %20 = dma.hbm_to_vmem [thread:$0]  %s16_s11, 64, %s18_s13, [#allocation3]  }
   0x5   :  { %s517_s17 = smov [#allocation5]   ;;  %s518_s19 = smov 64  }
   0x6   :  { %s27_s18 = sshll.u32 %s517_s17, 4  ;;  %s519_s20 = smov 4   ;;  %s28_s18 = int_to_ptr.vmem [resolvable:$true] %s27_s18 }
   0x7   :  { %33 = dma.hbm_to_vmem [thread:$0]  %s26_s16, 3456, %s28_s18, [#allocation6], %s518_s19, %s518_s19, %s519_s20  }
   0x8   :  { %510 = dma.done.wait [#allocation3], 64  }
   0x9   :  { %511 = vsyncadd [#allocation3], 4294967232 }
   0xa   :  { %512 = dma.done.wait [#allocation6], 3456  }
   0xb   :  { %513 = vsyncadd [#allocation6], 4294963840  ;;  %v410_v0 = vld [vmem:[#allocation5 + $0x38] sm:$0xff]  ;;  %v409_v1 = vld [vmem:[#allocation5 + $0x30] sm:$0xff]  ;;  %s520_s0 = smov [#allocation7]   ;;  %s296_s23 = sshll.u32 %s547_s2, 4  ;;  %s297_s23 = int_to_ptr.hbm [resolvable:$true] %s296_s23 }
   0xc   :  { %110 = vmatpush.bf16.msra.mxu0 %v410_v0  ;;  %v418_v2 = vld [vmem:[#allocation5 + $0x80] sm:$0xff]  ;;  %v417_v3 = vld [vmem:[#allocation5 + $0x78] sm:$0xff]  ;;  %v408_v4 = vld [vmem:[#allocation5 + $0x28] sm:$0xff]  ;;  %s294_s1 = sshll.u32 %s520_s0, 4  ;;  %s295_s1 = int_to_ptr.vmem [resolvable:$true] %s294_s1 }
   0xd   :  { %192 = vmatpush.bf16.msra.mxu1 %v418_v2  ;;  %v416_v5 = vld [vmem:[#allocation5 + $0x70] sm:$0xff]  ;;  %v407_v6 = vld [vmem:[#allocation5 + $0x20] sm:$0xff]  ;;  %v415_v7 = vld [vmem:[#allocation5 + $0x68] sm:$0xff] }
   0xe   :  { %v406_v8 = vld [vmem:[#allocation5 + $0x18] sm:$0xff]  ;;  %v414_v9 = vld [vmem:[#allocation5 + $0x60] sm:$0xff]  ;;  %v405_v10 = vld [vmem:[#allocation5 + $0x10] sm:$0xff] }
   0xf   :  { %v404_v11 = vld [vmem:[#allocation5 + $0x8] sm:$0xff]  ;;  %v403_v12 = vld [vmem:[#allocation5] sm:$0xff]  ;;  %v60_v13 = vld [vmem:[#allocation2] sm:$0xf] }
  0x10   :  { %111 = vmatpush.bf16.msra.mxu0 %v409_v1  ;;  %v413_v14 = vld [vmem:[#allocation5 + $0x58] sm:$0xff]  ;;  %v412_v15 = vld [vmem:[#allocation5 + $0x50] sm:$0xff]  ;;  %v411_v16 = vld [vmem:[#allocation5 + $0x48] sm:$0xff] }
  0x11   :  { %193 = vmatpush.bf16.msra.mxu1 %v417_v3  ;;  %v426_v17 = vld [vmem:[#allocation5 + $0xc8] sm:$0xff]  ;;  %v425_v18 = vld [vmem:[#allocation5 + $0xc0] sm:$0xff]  ;;  %v424_v19 = vld [vmem:[#allocation5 + $0xb8] sm:$0xff] }
  0x12   :  { %274 = vmatpush.bf16.msra.mxu2 %v426_v17  ;;  %v58_v20 = vld [vmem:[#allocation5 + $0x40] sm:$0x1]  ;;  %v423_v21 = vld [vmem:[#allocation5 + $0xb0] sm:$0xff]  ;;  %v422_v23 = vld [vmem:[#allocation5 + $0xa8] sm:$0xff] }
  0x13   :  { %v59_v22 = vunpack.c.l.bf16 %v58_v20  ;;  %v421_v30 = vld [vmem:[#allocation5 + $0xa0] sm:$0xff]  ;;  %v420_v31 = vld [vmem:[#allocation5 + $0x98] sm:$0xff]  ;;  %v419_v32 = vld [vmem:[#allocation5 + $0x90] sm:$0xff] }
  0x14   :  { %112 = vmatpush.bf16.msra.mxu0 %v408_v4  ;;  %v140_v33 = vld [vmem:[#allocation5 + $0x88] sm:$0x1]  ;;  %v222_v41 = vld [vmem:[#allocation5 + $0xd0] sm:$0x1] }
  0x15   :  { %194 = vmatpush.bf16.msra.mxu1 %v416_v5  ;;  %v61_v24 = vperm.slane %v59_v22, 0  ;;  %v141_v34 = vunpack.c.l.bf16 %v140_v33  ;;  %v223_v42 = vunpack.c.l.bf16 %v222_v41 }
  0x16   :  { %275 = vmatpush.bf16.msra.mxu2 %v425_v18 }
  0x17   :  { %v143_v35 = vperm.slane %v141_v34, 0  ;;  %v225_v43 = vperm.slane %v223_v42, 0 }
  0x18   :  { %113 = vmatpush.bf16.msra.mxu0 %v407_v6 }
  0x19   :  { %195 = vmatpush.bf16.msra.mxu1 %v415_v7 }
  0x1a   :  { %276 = vmatpush.bf16.msra.mxu2 %v424_v19 }
  0x1c   :  { %114 = vmatpush.bf16.msra.mxu0 %v406_v8 }
  0x1d   :  { %196 = vmatpush.bf16.msra.mxu1 %v414_v9 }
  0x1e   :  { %277 = vmatpush.bf16.msra.mxu2 %v423_v21 }
  0x20   :  { %115 = vmatpush.bf16.msra.mxu0 %v405_v10 }
  0x21   :  { %197 = vmatpush.bf16.msra.mxu1 %v413_v14 }
  0x22   :  { %278 = vmatpush.bf16.msra.mxu2 %v422_v23 }
  0x24   :  { %116 = vmatpush.bf16.msra.mxu0 %v404_v11 }
  0x25   :  { %198 = vmatpush.bf16.msra.mxu1 %v412_v15 }
  0x26   :  { %279 = vmatpush.bf16.msra.mxu2 %v421_v30 }
  0x28   :  { %117 = vmatpush.bf16.msra.mxu0 %v403_v12 }
  0x29   :  { %199 = vmatpush.bf16.msra.mxu1 %v411_v16 }
  0x2a   :  { %280 = vmatpush.bf16.msra.mxu2 %v420_v31 }
  0x2b   :  { %118 = vmatmul.bf16.vlgmr.msra.gmra.mxu0 %v60_v13 }
  0x2e   :  { %281 = vmatpush.bf16.msra.mxu2 %v419_v32 }
  0xa8   :  { %v119_v25 = vpop.f32.mrf.mxu0 }
  0xa9   :  { %v120_v26 = vadd.f32 %v119_v25, %v61_v24 }
  0xab   :  { %432 = vtanh.f32 %v120_v26 }
  0xb0   :  { %v121_v27 = vpop.f32.mrf.mxu0 }
  0xb1   :  { %v433_v28 = vpop.eup %432 }
  0xb2   :  { %v142_v29 = vpack.c.bf16 %v433_v28, %v433_v28 }
  0xb4   :  { %200 = vmatmul.bf16.vlgmr.msra.gmra.mxu1 %v142_v29 }
 0x131   :  { %v201_v36 = vpop.f32.mrf.mxu1 }
 0x132   :  { %v202_v37 = vadd.f32 %v201_v36, %v143_v35 }
 0x134   :  { %434 = vtanh.f32 %v202_v37 }
 0x139   :  { %v203_v38 = vpop.f32.mrf.mxu1 }
 0x13a   :  { %v435_v39 = vpop.eup %434 }
 0x13b   :  { %v224_v40 = vpack.c.bf16 %v435_v39, %v435_v39 }
 0x13d   :  { %282 = vmatmul.bf16.vlgmr.msra.gmra.mxu2 %v224_v40 }
 0x1c0   :  { %v283_v44 = vpop.f32.mrf.mxu2 }
 0x1c1   :  { %v284_v45 = vadd.f32 %v283_v44, %v225_v43 }
 0x1c3   :  { %436 = vtanh.f32 %v284_v45 }
 0x1c8   :  { %v285_v46 = vpop.f32.mrf.mxu2 }
 0x1c9   :  { %v437_v47 = vpop.eup %436 }
 0x1ca   :  { %288 = vst [vmem:[#allocation7] sm:$0xff] %v437_v47 }
 0x1cb   :  { %299 = dma.vmem_to_hbm [thread:$0]  %s295_s1, 128, %s297_s23, [#allocation4]  }
 0x1cc   :  { %514 = dma.done.wait [#allocation4], 128  }
 0x1cd   :  { %515 = vsyncadd [#allocation4], 4294967168 }
 0x1ce   :  { %304 = vsyncpa [#allocation3], 1 }
 0x1cf   :  { %305 = vsyncpa [#allocation6], 1 }
 0x1d0   :  { %306 = vsyncpa [#allocation4], 1 }

</bundles_post_ra>
